<compile_context>
chip_gen: v6e
topology: v6e:2x2x1
jax: 0.10.0
libtpu: 0.0.40
codegen_flags: <defaults>
</compile_context>

<pallas_src>
import functools
import math

import jax
import jax.numpy as jnp
from jax.experimental import pallas as pl
from jax.experimental.pallas import tpu as pltpu

_MIB = 2 ** 20


# ----------------------------------------------------------------------------
# Small helpers
# ----------------------------------------------------------------------------
def _physical_vmem_bytes():
    """Per-core VMEM capacity; conservative fallback when not on a TPU host."""
    try:
        cap = getattr(pltpu.get_tpu_info(), "vmem_capacity_bytes", None)
        if cap:
            return int(cap)
    except Exception:
        pass
    return 64 * _MIB  # v7x per-TensorCore VMEM (smallest of v5e/v6e/v7x)


def _vmem_limit_bytes(est_bytes, phys_bytes):
    hi = max(16 * _MIB, phys_bytes - 4 * _MIB)  # always leave headroom below physical
    return int(min(hi, max(32 * _MIB, int(est_bytes * 1.3))))


def _pick_tile(length, step, fits):
    """Largest row tile (multiple of `step`, or the full length) whose VMEM
    estimate fits the budget.  Never falls back to an unbounded tile."""
    if length <= 1024 and fits(length):
        return length
    for cand in (1024, 512, 256, 128, 64, 32, 16, 8):
        if cand % step or cand > length:
            continue
        if fits(cand):
            return cand
    return min(step, length)


def _erf(x):
    # Abramowitz & Stegun 7.1.26 (max abs error ~1.5e-7); keeps the module's
    # exact-erf GELU semantics without relying on a lax.erf Mosaic lowering.
    a1, a2, a3, a4, a5 = (0.254829592, -0.284496736, 1.421413741,
                          -1.453152027, 1.061405429)
    p = 0.3275911
    ax = jnp.abs(x)
    # TODO(synk): pl.reciprocal(..., approx=True) would move this divide to the
    # EUP, but exact division is kept for numerical parity with torch.erf.
    t = 1.0 / (1.0 + p * ax)
    poly = ((((a5 * t + a4) * t + a3) * t + a2) * t + a1) * t
    y = 1.0 - poly * jnp.exp(-ax * ax)
    return jnp.where(x < 0.0, -y, y)


def _gelu(x):
    return x * 0.5 * (1.0 + _erf(x * (1.0 / math.sqrt(2.0))))


def _layer_norm(x, gamma, beta, eps):
    mu = jnp.mean(x, axis=-1, keepdims=True)
    diff = x - mu
    var = jnp.mean(diff * diff, axis=-1, keepdims=True)
    return diff * (1.0 / jnp.sqrt(var + eps)) * gamma + beta


# ----------------------------------------------------------------------------
# Stage 1: token-wise dense projection kernel (K / Q / V computed once)
# ----------------------------------------------------------------------------
def _dense_kernel(x_ref, w_ref, b_ref, o_ref):
    x = x_ref[0].astype(w_ref.dtype)
    y = jnp.dot(x, w_ref[...], preferred_element_type=jnp.float32) + b_ref[...]
    o_ref[0] = y.astype(o_ref.dtype)


def _dense(x, w, b_row, out_dtype, phys_vmem):
    """y[b, l, :] = x[b, l, :] @ w + b, one Pallas call, grid = (batch, row-blocks)."""
    bsz, length, d_in = x.shape
    d_out = w.shape[1]
    mm_bytes = jnp.dtype(w.dtype).itemsize
    x_bytes = jnp.dtype(x.dtype).itemsize
    out_bytes = jnp.dtype(out_dtype).itemsize
    step = 16 if mm_bytes < 4 else 8

    def est(tl):
        io = 2 * (tl * d_in * x_bytes + tl * d_out * out_bytes)
        wts = 2 * (d_in * d_out * mm_bytes + d_out * 4)
        tmp = 4 * (2 * tl * d_out + tl * d_in)
        return io + wts + tmp

    budget = int(0.6 * phys_vmem)
    tl = _pick_tile(length, step, lambda t: est(t) <= budget)
    grid = (bsz, pl.cdiv(length, tl))

    cost = pl.CostEstimate(
        flops=2 * bsz * length * d_in * d_out,
        transcendentals=0,
        bytes_accessed=int(x.nbytes) + int(w.nbytes) + int(b_row.nbytes)
        + bsz * length * d_out * out_bytes)

    return pl.pallas_call(
        _dense_kernel,
        out_shape=jax.ShapeDtypeStruct((bsz, length, d_out), out_dtype),
        grid_spec=pltpu.PrefetchScalarGridSpec(
            num_scalar_prefetch=0,
            grid=grid,
            in_specs=[
                pl.BlockSpec((1, tl, d_in), lambda bb, r: (bb, r, 0)),
                pl.BlockSpec((d_in, d_out), lambda bb, r: (0, 0)),
                pl.BlockSpec((1, d_out), lambda bb, r: (0, 0)),
            ],
            out_specs=pl.BlockSpec((1, tl, d_out), lambda bb, r: (bb, r, 0)),
        ),
        compiler_params=pltpu.CompilerParams(
            dimension_semantics=("parallel", "parallel"),
            vmem_limit_bytes=_vmem_limit_bytes(est(tl), phys_vmem)),
        cost_estimate=cost,
    )(x, w, b_row)


# ----------------------------------------------------------------------------
# Stage 2: fused attention core + output proj + LN + FFN + LN
# ----------------------------------------------------------------------------
def _encoder_kernel(qh_ref, kh_ref, vh_ref, qin_ref, mask_ref,
                    wo_ref, bo_ref, g1_ref, be1_ref,
                    w1_ref, b1_ref, w2_ref, b2_ref, g2_ref, be2_ref,
                    out_ref, *, num_heads, scaled, eps):
    qh = qh_ref[0]                                   # (H, TQ, d)   matmul dtype
    kh = kh_ref[0]                                   # (H, Lk, d)
    vh = vh_ref[0]                                   # (H, Lk, d)
    q_in = qin_ref[0].astype(jnp.float32)            # (TQ, hid)    residual input
    mask = mask_ref[0]                               # (1, Lk)      1.0 = keep

    d = qh.shape[-1]
    mm_dtype = kh.dtype

    # Scores for all heads with one batched (leading-head-dim) matmul.
    s = jnp.einsum("hqd,hkd->hqk", qh, kh,
                   preferred_element_type=jnp.float32)            # (H, TQ, Lk)
    if scaled:
        s = s * (1.0 / math.sqrt(d))

    # Mask bias computed once (no per-head compare / select / broadcast).
    bias = jnp.where(mask > 0.0, 0.0, -1e15)                      # (1, Lk)
    s = s + bias[None, :, :]

    # Softmax (f32, exact reciprocal -- required for parity with the reference).
    s = s - jnp.max(s, axis=-1, keepdims=True)
    p = jnp.exp(s)
    p = p / jnp.sum(p, axis=-1, keepdims=True)
    # TODO(synk): attention dropout omitted (identity in eval mode).

    ctx = jnp.einsum("hqk,hkd->hqd", p.astype(mm_dtype), vh,
                     preferred_element_type=jnp.float32)          # (H, TQ, d)

    # Output projection: fold the head-concat into Wo -- accumulate per-head
    # partial products into a lane-dense (TQ, hidden) f32 accumulator.
    wo = wo_ref[...]                                              # (H, d, hid)
    h1 = jnp.dot(ctx[0].astype(mm_dtype), wo[0],
                 preferred_element_type=jnp.float32)
    for h in range(1, num_heads):
        h1 = h1 + jnp.dot(ctx[h].astype(mm_dtype), wo[h],
                          preferred_element_type=jnp.float32)
    h1 = h1 + bo_ref[...]
    # TODO(synk): hidden dropout omitted (identity in eval mode).
    x1 = _layer_norm(h1 + q_in, g1_ref[...], be1_ref[...], eps)

    # FFN: dense -> GELU -> dense + residual + LayerNorm (f32 elementwise math).
    t = jnp.dot(x1.astype(mm_dtype), w1_ref[...],
                preferred_element_type=jnp.float32) + b1_ref[...]
    t = _gelu(t)
    h2 = jnp.dot(t.astype(mm_dtype), w2_ref[...],
                 preferred_element_type=jnp.float32) + b2_ref[...]
    out_ref[0] = _layer_norm(h2 + x1, g2_ref[...], be2_ref[...],
                             eps).astype(out_ref.dtype)


def transf_encoder_abs(key, query, value, key_mask, params, num_heads,
                       scaled=True, eps=1e-12, matmul_dtype=jnp.float32):
    """Forward pass of TransfEncoderAbs (eval mode).

    matmul_dtype: dtype fed to the MXU (weights + matmul activations).
    jnp.bfloat16 is recommended on v6e/v7x (accumulation stays f32);
    jnp.float32 keeps exact parity with the PyTorch module.
    """
    batch, l_q, hidden = query.shape
    l_k = key.shape[1]
    inter = params["W1"].shape[1]
    assert hidden % num_heads == 0
    d = hidden // num_heads

    mm_dtype = jnp.dtype(matmul_dtype)
    mm_bytes = mm_dtype.itemsize
    phys_vmem = _physical_vmem_bytes()

    def row(v, n):
        return jnp.asarray(v, jnp.float32).reshape(1, n)

    wk = params["Wk"].astype(mm_dtype)
    wq = params["Wq"].astype(mm_dtype)
    wv = params["Wv"].astype(mm_dtype)

    # --- Stage 1: project K, Q, V once per token (separate Pallas calls). ---
    q_proj = _dense(query, wq, row(params["bq"], hidden), mm_dtype, phys_vmem)
    k_proj = _dense(key, wk, row(params["bk"], hidden), mm_dtype, phys_vmem)
    v_proj = _dense(value, wv, row(params["bv"], hidden), mm_dtype, phys_vmem)

    # Head-major layout so the attention kernel uses batched (leading head dim)
    # matmuls with no in-kernel transposes.  Cheap one-time XLA reshuffle.
    def to_heads(x, length):
        return x.reshape(batch, length, num_heads, d).transpose(0, 2, 1, 3)

    q_h = to_heads(q_proj, l_q)
    k_h = to_heads(k_proj, l_k)
    v_h = to_heads(v_proj, l_k)

    # Wo with its input rows split per head: attn_vec @ Wo == sum_h ctx_h @ Wo_h.
    wo_h = params["Wo"].astype(mm_dtype).reshape(num_heads, d, hidden)
    w1 = params["W1"].astype(mm_dtype)
    w2 = params["W2"].astype(mm_dtype)

    mask_f = key_mask.astype(jnp.float32).reshape(batch, 1, l_k)

    weight_args = (
        wo_h, row(params["bo"], hidden),
        row(params["ln1_g"], hidden), row(params["ln1_b"], hidden),
        w1, row(params["b1"], inter),
        w2, row(params["b2"], hidden),
        row(params["ln2_g"], hidden), row(params["ln2_b"], hidden),
    )

    # --- VMEM- and dtype-aware query-tile choice. ---
    def est(tq):
        dbl = 2  # double-buffered pipeline blocks
        io = dbl * (num_heads * tq * d * mm_bytes          # q heads
                    + 2 * num_heads * l_k * d * mm_bytes   # k, v heads
                    + 2 * tq * hidden * 4                  # raw query + output
                    + l_k * 4)                             # mask
        wts = dbl * ((hidden * hidden + 2 * hidden * inter) * mm_bytes
                     + (7 * hidden + inter) * 4)
        tmp = 4 * (2 * num_heads * tq * l_k                # scores / probs
                   + 2 * num_heads * tq * d                # ctx
                   + 2 * tq * inter                        # FFN activation
                   + 6 * tq * hidden)                      # h1 / x1 / h2 / ...
        return io + wts + tmp

    step = 16 if mm_bytes < 4 else 8
    budget = int(0.6 * phys_vmem)
    tq = _pick_tile(l_q, step, lambda t: est(t) <= budget)
    n_q_blocks = pl.cdiv(l_q, tq)

    def full_spec(shape):
        return pl.BlockSpec(shape, lambda b, qi, _n=len(shape): (0,) * _n)

    # TODO(synk): for very long Lk, add a kv grid axis with online-softmax
    # (flash-style) scratch so K/V VMEM is bounded independently of Lk.
    in_specs = [
        pl.BlockSpec((1, num_heads, tq, d), lambda b, qi: (b, 0, qi, 0)),   # q heads
        pl.BlockSpec((1, num_heads, l_k, d), lambda b, qi: (b, 0, 0, 0)),   # k heads
        pl.BlockSpec((1, num_heads, l_k, d), lambda b, qi: (b, 0, 0, 0)),   # v heads
        pl.BlockSpec((1, tq, hidden), lambda b, qi: (b, qi, 0)),            # raw query
        pl.BlockSpec((1, 1, l_k), lambda b, qi: (b, 0, 0)),                 # mask
    ] + [full_spec(w.shape) for w in weight_args]

    flops = (4 * batch * num_heads * l_q * l_k * d          # scores + AV
             + 2 * batch * l_q * hidden * hidden            # Wo
             + 4 * batch * l_q * hidden * inter)            # W1 + W2
    transcend = batch * num_heads * l_q * l_k + batch * l_q * inter
    bytes_acc = (int(q_h.nbytes) + int(k_h.nbytes) + int(v_h.nbytes)
                 + int(query.nbytes) + int(mask_f.nbytes)
                 + sum(int(w.nbytes) for w in weight_args)
                 + batch * l_q * hidden * 4)
    cost = pl.CostEstimate(flops=int(flops), transcendentals=int(transcend),
                           bytes_accessed=int(bytes_acc))

    out = pl.pallas_call(
        functools.partial(_encoder_kernel, num_heads=num_heads,
                          scaled=scaled, eps=eps),
        out_shape=jax.ShapeDtypeStruct((batch, l_q, hidden), jnp.float32),
        grid_spec=pltpu.PrefetchScalarGridSpec(
            num_scalar_prefetch=0,
            grid=(batch, n_q_blocks),
            in_specs=in_specs,
            out_specs=pl.BlockSpec((1, tq, hidden), lambda b, qi: (b, qi, 0)),
        ),
        compiler_params=pltpu.CompilerParams(
            dimension_semantics=("parallel", "parallel"),
            vmem_limit_bytes=_vmem_limit_bytes(est(tq), phys_vmem)),
        cost_estimate=cost,
    )(q_h, k_h, v_h, query, mask_f, *weight_args)
    return out


# ----------------------------------------------------------------------------
# Pure-JAX reference (mirrors the PyTorch module; HIGHEST-precision matmuls so
# the reference itself is true f32 even on a TPU backend).
# ----------------------------------------------------------------------------
def reference(key, query, value, key_mask, params, num_heads, scaled=True, eps=1e-12):
    batch, l_q, hidden = query.shape
    d = hidden // num_heads
    hp = jax.lax.Precision.HIGHEST

    def mm(a, b):
        return jnp.matmul(a, b, precision=hp)

    def layer_norm(x, g, b):
        mu = jnp.mean(x, axis=-1, keepdims=True)
        var = jnp.mean(jnp.square(x - mu), axis=-1, keepdims=True)
        return (x - mu) / jnp.sqrt(var + eps) * g + b

    def gelu(x):
        return x * 0.5 * (1.0 + jax.lax.erf(x / math.sqrt(2.0)))

    k = mm(key, params["Wk"]) + params["bk"]
    q = mm(query, params["Wq"]) + params["bq"]
    v = mm(value, params["Wv"]) + params["bv"]
    k = k.reshape(batch, -1, num_heads, d).transpose(0, 2, 1, 3)
    q = q.reshape(batch, -1, num_heads, d).transpose(0, 2, 1, 3)
    v = v.reshape(batch, -1, num_heads, d).transpose(0, 2, 1, 3)
    s = jnp.einsum("bhqd,bhkd->bhqk", q, k, precision=hp)
    if scaled:
        s = s / math.sqrt(d)
    mask = key_mask[:, None, None, :]
    s = jnp.where(mask > 0, s, -1e15)
    p = jax.nn.softmax(s, axis=-1)
    ctx = jnp.einsum("bhqk,bhkd->bhqd", p, v, precision=hp)
    attn_vec = ctx.transpose(0, 2, 1, 3).reshape(batch, l_q, hidden)

    x1 = layer_norm(mm(attn_vec, params["Wo"]) + params["bo"] + query,
                    params["ln1_g"], params["ln1_b"])
    h = gelu(mm(x1, params["W1"]) + params["b1"])
    out = layer_norm(mm(h, params["W2"]) + params["b2"] + x1,
                     params["ln2_g"], params["ln2_b"])
    return out


if __name__ == "__main__":
    batch, seq, hidden, num_heads, inter = 2, 8, 32, 4, 64
    eps = 1e-12

    rng = jax.random.PRNGKey(0)
    ks = jax.random.split(rng, 20)

    key = jax.random.normal(ks[0], (batch, seq, hidden), jnp.float32)
    query = jax.random.normal(ks[1], (batch, seq, hidden), jnp.float32)
    value = jax.random.normal(ks[2], (batch, seq, hidden), jnp.float32)
    key_mask = jnp.array([[1] * seq, [1] * 5 + [0] * (seq - 5)], dtype=jnp.int32)

    ws = 1.0 / math.sqrt(hidden)
    params = {
        "Wk": jax.random.normal(ks[3], (hidden, hidden), jnp.float32) * ws,
        "bk": jax.random.normal(ks[4], (hidden,), jnp.float32) * ws,
        "Wq": jax.random.normal(ks[5], (hidden, hidden), jnp.float32) * ws,
        "bq": jax.random.normal(ks[6], (hidden,), jnp.float32) * ws,
        "Wv": jax.random.normal(ks[7], (hidden, hidden), jnp.float32) * ws,
        "bv": jax.random.normal(ks[8], (hidden,), jnp.float32) * ws,
        "Wo": jax.random.normal(ks[9], (hidden, hidden), jnp.float32) * ws,
        "bo": jax.random.normal(ks[10], (hidden,), jnp.float32) * ws,
        "ln1_g": 1.0 + 0.1 * jax.random.normal(ks[11], (hidden,), jnp.float32),
        "ln1_b": 0.1 * jax.random.normal(ks[12], (hidden,), jnp.float32),
        "W1": jax.random.normal(ks[13], (hidden, inter), jnp.float32) * ws,
        "b1": jax.random.normal(ks[14], (inter,), jnp.float32) * ws,
        "W2": jax.random.normal(ks[15], (inter, hidden), jnp.float32) / math.sqrt(inter),
        "b2": jax.random.normal(ks[16], (hidden,), jnp.float32) * ws,
        "ln2_g": 1.0 + 0.1 * jax.random.normal(ks[17], (hidden,), jnp.float32),
        "ln2_b": 0.1 * jax.random.normal(ks[18], (hidden,), jnp.float32),
    }

    ref = reference(key, query, value, key_mask, params, num_heads,
                    scaled=True, eps=eps)

    # Exact (f32-matmul) path: tight check against the f32 reference.
    out = transf_encoder_abs(key, query, value, key_mask, params, num_heads,
                             scaled=True, eps=eps, matmul_dtype=jnp.float32)
    out = jax.block_until_ready(out)
    assert out.shape == (batch, seq, hidden)
    err = float(jnp.max(jnp.abs(out - ref)))
    assert err < 2e-3, "f32 path max abs err = %f" % err

    # bf16-MXU fast path (recommended on v6e/v7x): loose smoke check.
    out_bf16 = transf_encoder_abs(key, query, value, key_mask, params, num_heads,
                                  scaled=True, eps=eps, matmul_dtype=jnp.bfloat16)
    out_bf16 = jax.block_until_ready(out_bf16)
    err16 = float(jnp.max(jnp.abs(out_bf16 - ref)))
    assert err16 < 1e-1, "bf16 path max abs err = %f" % err16

    print("KERNEL_OK")
</pallas_src>

<mosaic_0001>
module attributes {stable_mosaic.version = 11 : i64} {
  func.func @_dense_kernel(%arg0: i32, %arg1: i32, %arg2: memref<1x8x32xf32, #tpu.memory_space<vmem>>, %arg3: memref<32x32xf32, #tpu.memory_space<vmem>>, %arg4: memref<1x32xf32, #tpu.memory_space<vmem>>, %arg5: memref<1x8x32xf32, #tpu.memory_space<vmem>>) attributes {dimension_semantics = [#tpu.dimension_semantics<parallel>, #tpu.dimension_semantics<parallel>], iteration_bounds = array<i64: 2, 1>, scalar_prefetch = 0 : i64, scratch_operands = 0 : i64, tpu.core_type = #tpu.core_type<tc>, window_params = [{transform_indices = @transform_0, window_bounds = array<i64: 1, 8, 32>}, {pipeline_mode = #tpu.pipeline_mode<synchronous>, transform_indices = @transform_1, window_bounds = array<i64: 32, 32>}, {pipeline_mode = #tpu.pipeline_mode<synchronous>, transform_indices = @transform_2, window_bounds = array<i64: 1, 32>}, {transform_indices = @transform_3, window_bounds = array<i64: 1, 8, 32>}]} {
    %c0 = arith.constant 0 : index
    %c0_0 = arith.constant 0 : index
    %c0_1 = arith.constant 0 : index
    %0 = vector.load %arg2[%c0, %c0_0, %c0_1] : memref<1x8x32xf32, #tpu.memory_space<vmem>>, vector<1x8x32xf32>
    %1 = vector.shape_cast %0 : vector<1x8x32xf32> to vector<8x32xf32>
    %c0_2 = arith.constant 0 : index
    %c0_3 = arith.constant 0 : index
    %2 = vector.load %arg3[%c0_2, %c0_3] : memref<32x32xf32, #tpu.memory_space<vmem>>, vector<32x32xf32>
    %cst = arith.constant dense<0.000000e+00> : vector<8x32xf32>
    %3 = tpu.matmul %1, %2, %cst {dimension_numbers = #tpu.dot_dimension_numbers<[1], [0], [0], [1], [0, 0, 1, 1], [], []>} : vector<8x32xf32>, vector<32x32xf32>, vector<8x32xf32> -> vector<8x32xf32>
    %c0_4 = arith.constant 0 : index
    %c0_5 = arith.constant 0 : index
    %4 = vector.load %arg4[%c0_4, %c0_5] : memref<1x32xf32, #tpu.memory_space<vmem>>, vector<1x32xf32>
    %5 = vector.broadcast %4 : vector<1x32xf32> to vector<8x32xf32>
    %6 = arith.addf %3, %5 : vector<8x32xf32>
    %c0_6 = arith.constant 0 : index
    %c0_7 = arith.constant 0 : index
    %c0_8 = arith.constant 0 : index
    %7 = vector.load %arg5[%c0_6, %c0_7, %c0_8] : memref<1x8x32xf32, #tpu.memory_space<vmem>>, vector<1x8x32xf32>
    %8 = vector.shape_cast %7 : vector<1x8x32xf32> to vector<8x32xf32>
    %9 = vector.shape_cast %6 : vector<8x32xf32> to vector<1x8x32xf32>
    tpu.vector_store %arg5[%c0_6, %c0_7, %c0_8], %9 {strides = array<i32>} : memref<1x8x32xf32, #tpu.memory_space<vmem>>, vector<1x8x32xf32>,
    return
  }
  func.func @transform_0(%arg0: i32, %arg1: i32) -> (i32, i32, i32) {
    %c0_i32 = arith.constant 0 : i32
    %c0_i32_0 = arith.constant 0 : i32
    return %arg0, %arg1, %c0_i32 : i32, i32, i32
  }
  func.func @transform_1(%arg0: i32, %arg1: i32) -> (i32, i32) {
    %c0_i32 = arith.constant 0 : i32
    %c0_i32_0 = arith.constant 0 : i32
    %c0_i32_1 = arith.constant 0 : i32
    return %c0_i32, %c0_i32_0 : i32, i32
  }
  func.func @transform_2(%arg0: i32, %arg1: i32) -> (i32, i32) {
    %c0_i32 = arith.constant 0 : i32
    %c0_i32_0 = arith.constant 0 : i32
    %c0_i32_1 = arith.constant 0 : i32
    return %c0_i32, %c0_i32_0 : i32, i32
  }
  func.func @transform_3(%arg0: i32, %arg1: i32) -> (i32, i32, i32) {
    %c0_i32 = arith.constant 0 : i32
    %c0_i32_0 = arith.constant 0 : i32
    return %arg0, %arg1, %c0_i32 : i32, i32, i32
  }
}

</mosaic_0001>

<bundles_post_ra>
// kernel: tpu_custom_call.1
= control target key start
LH: loop header
LB: loop body
LE: loop exit
PB: predicated region body
PF: predicated region fallthrough
CT: control target
= control target key end

     0   :  { %8 = vsyncpa [#allocation3], 0  ;;  %s863_s0 = inlined_call_operand.hbm [shape: f32[2,8,32], index: 0, kind: input, shape index: {}]   ;;  %s864_s1 = inlined_call_operand.hbm [shape: f32[32,32], index: 1, kind: input, shape index: {}]   ;;  %s865_s2 = inlined_call_operand.vmem [shape: f32[1,32], index: 2, kind: input, shape index: {}]   ;;  %s866_s3 = inlined_call_operand.hbm [shape: f32[2,8,32], index: 3, kind: output, shape index: {}]  }
   0x1   :  { %10 = vsyncpa [#allocation3 + $0x1], 0 }
   0x2   :  { %11 = vsyncpa [#allocation6], 0 }
   0x3   :  { %12 = vsyncpa [#allocation4], 0 }
   0x4   :  { %14 = vsyncpa [#allocation4 + $0x1], 0  ;;  %s687_s12 = smov 0   ;;  %s689_s13 = smov 0  }
   0x5   :  { %s691_s14 = smov 0   ;;  %s693_s15 = smov 0  }
   0x6   :  { %s695_s16 = smov 0   ;;  %s697_s17 = smov 0  }
   0x7 LB: > { %s410_s18 = sadd.s32 4294967295, %s658_s17   ;;  %s411_s19 = sadd.s32 4294967294, %s658_s17   ;;  %s658_s17 = sphi %s697_s17, %s20_s17   ;;  %s654_s16 = sphi %s695_s16, %s884_s16   ;;  %s650_s15 = sphi %s693_s15, %s883_s15   ;;  %s646_s14 = sphi %s691_s14, %s882_s14   ;;  %s642_s13 = sphi %s689_s13, %s881_s13   ;;  %s638_s12 = sphi %s687_s12, %s880_s12  }
   0x8   : > { %p54_p0 = scmp.ne.s32.totalorder %s642_s13, %s638_s12  ;;  %p721_p1 = scmp.eq.s32.totalorder %s410_s18, 0 }
   0x9   : > { %p725_p2 = scmp.eq.s32.totalorder %s410_s18, 1  ;;  %p128_p3 = scmp.eq.s32.totalorder %s411_s19, 1 }
   0xa   : > { %p731_p4 = por %p721_p1, %p54_p0  ;;  %p412_p5 = scmp.ge.s32.totalorder %s658_s17, 1 }
   0xb   : > { %p736_p6 = por %p128_p3, %p54_p0  ;;  %p135_p7 = scmp.lt.s32.totalorder %s658_s17, 3 }
   0xc   : > { %s870_s22 = scalar_select %p731_p4, 1, 0 }
   0xd   : > { %s871_s23 = scalar_select %p736_p6, 1, 0 }
   0xe   : > { %p741_p8 = pnand %p412_p5, %p135_p7  ;;  %s660_s25 = smov [#allocation5]  }
   0xf   : > { %s147_s26 = sshll.u32 %s660_s25, 4  ;;  %s32_s28 = sadd.s32 1, %s654_s16  ;;  %s148_s26 = int_to_ptr.vmem [resolvable:$true] %s147_s26 }
  0x10   : > { %p451_p9 = pneg %p741_p8  ;;  %s531_s29 = scalar_lea.vmem %s148_s26, 512 }
  0x11   : > { %p532_p13 = scmp.ne.s32.totalorder %s148_s26, %s531_s29  ;;  %p539_p5 = scmp.lt.s32.totalorder %s148_s26, %s148_s26 }
  0x12   : > { %p750_p11 = pnand %p451_p9, %p721_p1  ;;  %p540_p7 = scmp.lt.s32.totalorder %s531_s29, %s531_s29 }
  0x14   : > { %p522_p12 = pneg %p750_p11  ;;  %p541_p6 = por %p540_p7, %p539_p5 }
  0x16   : > { %p534_p0 = pnand %p532_p13, %p522_p12 }
  0x18   : > { %p535_p3 = pneg %p534_p0 }
  0x1a   : > { %p542_p4 = pnand %p541_p6, %p535_p3 }
  0x1c   : > { %545 = shalt.err (!%p542_p4)
}
  0x1d   : > { %s661_s30 = smov 128   ;;  %s662_s4 = smov 8  }
  0x1e   : > { %454 = dma.hbm_to_vmem [thread:$0]  (!%p750_p11), %s864_s1, 512, %s148_s26, [#allocation6], %s661_s30, %s661_s30, %s662_s4  }
  0x1f   : > { %p34_p6 = scmp.ge.s32.totalorder %s32_s28, 2  ;;  %s41_s7 = sadd.s32 1, %s646_s14 }
  0x20   : > { %p48_p4 = scmp.ne.s32.totalorder %s646_s14, %s642_s13  ;;  %p49_p9 = scmp.eq.s32.totalorder %s658_s17, 0 }
  0x21   : > { %s886_s28 = smov (%p34_p6, %s32_s28), 0  ;;  %p464_p0 = scmp.lt.s32.totalorder %s658_s17, 2 }
  0x22   : > { %p768_p12 = por %p49_p9, %p48_p4  ;;  %p774_p13 = por %p725_p2, %p48_p4 }
  0x23   : > { %s36_s10 = ssub.s32 %s654_s16, %s886_s28  ;;  %s164_s11 = sand.u32 1, %s646_s14  }
  0x24   : > { %p39_p11 = scmp.eq.s32.totalorder %s36_s10, 0  ;;  %s415_s18 = sshll.u32 %s164_s11, 3 }
  0x25   : > { %s416_s25 = sshll.u32 %s654_s16, 7  ;;  %s168_s30 = scalar_lea.vmem [#allocation2], %s415_s18 }
  0x26   : > { %s783_s19 = scalar_select %p39_p11, %s646_s14, %s41_s7  }
  0x27   : > { %s174_s29 = scalar_lea.hbm %s863_s0, %s416_s25  ;;  %s176_s4 = sshll.u32 %s168_s30, 4  ;;  %s177_s4 = int_to_ptr.vmem [resolvable:$true] %s176_s4 }
  0x28   : > { %p791_p2 = pnand %p464_p0, %p768_p12  ;;  %s165_s5 = scalar_lea.sflag [#allocation3], %s164_s11 }
  0x29   : > { %s559_s6 = scalar_lea.vmem %s177_s4, 128  ;;  %s663_s7 = smov [#allocation2]  }
  0x2a   : > { %p548_p3 = pneg %p791_p2  ;;  %p560_p5 = scmp.ne.s32.totalorder %s177_s4, %s559_s6 }
  0x2b   : > { %s564_s10 = sshll.u32 %s663_s7, 4  ;;  %s565_s10 = int_to_ptr.vmem [resolvable:$false] %s564_s10 }
  0x2c   : > { %p562_p7 = pnand %p560_p5, %p548_p3  ;;  %s566_s25 = scalar_lea.vmem %s565_s10, 256 }
  0x2d   : > { %p567_p4 = scmp.lt.s32.totalorder %s177_s4, %s565_s10  ;;  %p568_p9 = scmp.lt.s32.totalorder %s566_s25, %s559_s6 }
  0x2e   : > { %p563_p6 = pneg %p562_p7 }
  0x2f   : > { %p569_p11 = por %p568_p9, %p567_p4 }
  0x31   : > { %p570_p10 = pnand %p569_p11, %p563_p6 }
  0x33   : > { %573 = shalt.err (!%p570_p10)
}
  0x34   : > { %458 = dma.hbm_to_vmem [thread:$0]  (!%p791_p2), %s174_s29, 128, %s177_s4, %s165_s5  }
  0x35   : > { %185 = sbr.rel (%p741_p8) target bundleno = 278 (0x116), region = 32  ;;  %s802_s8 = sand.u32 (!%p741_p8), 1, %s642_s13  }
  0x36   : > { %s418_s11 = sshll.u32 (!%p741_p8), %s802_s8, 3  ;;  %s188_s18 = scalar_lea.sflag (!%p741_p8), [#allocation3], %s802_s8 }
  0x37   : > { %s191_s26 = scalar_lea.vmem (!%p741_p8), [#allocation2], %s418_s11  ;;  %p877_p12 = scmp.ne.s32.totalorder (!%p741_p8), %s870_s22, 0 }
  0x3a   : > { %625 = dma.done.wait (%p877_p12), %s188_s18, 128  }
  0x3b   : > { %627 = vsyncadd (%p877_p12), %s188_s18, 4294967168 }
  0x3c   : > { %629 = dma.done.wait (%p721_p1), [#allocation6], 512  }
  0x3d   : > { %631 = vsyncadd (%p721_p1), [#allocation6], 4294966784  ;;  %v664_v0 = vmov 0.0   ;;  %vm665_vm0 = vmmov 0   ;;  %v222_v1 = vld [vmem:[#allocation5 + $0x18] sm:$0xff]  ;;  %v221_v2 = vld [vmem:[#allocation5 + $0x10] sm:$0xff] }
  0x3e   : > { %432 = vmatprep.subr.mxu0 %v664_v0  ;;  %440 = vmatprep.mubr.msk.f32.mxu0 %vm665_vm0, %v664_v0  ;;  %v220_v3 = vld [vmem:[#allocation5 + $0x8] sm:$0xff]  ;;  %v219_v4 = vld [vmem:[#allocation5] sm:$0xff]  ;;  %v218_v5 = vld [vmem:[%s191_s26] sm:$0xff]  ;;  %vm230_vm1 = vcmask 261120   ;;  %s424_s24 = sshll.u32 %s650_s15, 7  ;;  %s217_s27 = scalar_lea.vmem [#allocation7], %s418_s11 }
  0x3f   : > { %433 = vmatpush3.msra.mxu0 %v222_v1  ;;  %v421_v6 = vld [vmem:[%s865_s2] ss:$0 sm:$0xff]  ;;  %s320_s29 = sshll.u32 %s217_s27, 4  ;;  %s821_s21 = scalar_lea.hbm %s866_s3, %s424_s24  ;;  %s321_s29 = int_to_ptr.vmem [resolvable:$true] %s320_s29 }
  0x40   : > { %434 = vmatprep.subr.mxu0 %v664_v0  ;;  %s306_s5 = scalar_lea.sflag [#allocation4], %s802_s8  ;;  %s574_s6 = scalar_lea.vmem %s321_s29, 128 }
  0x41   : > { %435 = vmatpush3.msra.mxu0 %v221_v2  ;;  %p575_p1 = scmp.ne.s32.totalorder %s321_s29, %s574_s6  ;;  %s666_s7 = smov [#allocation7]  }
  0x42   : > { %436 = vmatprep.subr.mxu0 %v664_v0  ;;  %s578_s15 = sshll.u32 %s666_s7, 4  ;;  %s579_s15 = int_to_ptr.vmem [resolvable:$false] %s578_s15 }
  0x43   : > { %437 = vmatpush3.msra.mxu0 %v220_v3  ;;  %p576_p8 = pnand %p575_p1, %p774_p13  ;;  %s580_s10 = scalar_lea.vmem %s579_s15, 256 }
  0x44   : > { %438 = vmatprep.subr.mxu0 %v664_v0  ;;  %p581_p0 = scmp.lt.s32.totalorder %s321_s29, %s579_s15  ;;  %p582_p2 = scmp.lt.s32.totalorder %s580_s10, %s574_s6 }
  0x45   : > { %439 = vmatpush3.msra.mxu0 %v219_v4  ;;  %p577_p10 = pneg %p576_p8 }
  0x46   : > { %441 = vmatmul.mubr.msk.f32.vlgmr.msra.gmra.mxu0 %vm230_vm1, %v218_v5  ;;  %p583_p3 = por %p582_p2, %p581_p0 }
  0x48   : > { %p584_p5 = pnand %p583_p3, %p577_p10 }
 0x106   : > { %v300_v7 = vpop.f32.mrf.mxu0 }
 0x107   : > { %v301_v8 = vadd.f32 %v421_v6, %v300_v7 }
 0x108   : > { %v442_v9 = vpop.f32.mrf.mxu0 }
 0x109   : > { %304 = vst.msk [vmem:[%s217_s27] sm:$0xff] %vm230_vm1, %v301_v8 }
 0x10a   : > { %587 = shalt.err (!%p584_p5)
}
 0x10b   : > { %s588_s25 = scalar_lea.hbm %s821_s21, 128  ;;  %s592_s18 = scalar_lea.hbm %s866_s3, 256 }
 0x10c   : > { %p589_p7 = scmp.ne.s32.totalorder %s821_s21, %s588_s25  ;;  %p593_p9 = scmp.lt.s32.totalorder %s821_s21, %s866_s3 }
 0x10d   : > { %p594_p11 = scmp.lt.s32.totalorder %s592_s18, %s588_s25 }
 0x10e   : > { %p590_p6 = pnand %p589_p7, %p774_p13 }
 0x10f   : > { %p595_p12 = por %p594_p11, %p593_p9 }
 0x110   : > { %p591_p4 = pneg %p590_p6 }
 0x112   : > { %p596_p1 = pnand %p595_p12, %p591_p4 }
 0x114   : > { %599 = shalt.err (!%p596_p1)
}
 0x115   : > { %449 = dma.vmem_to_hbm [thread:$0]  (%p774_p13), %s321_s29, 128, %s821_s21, %s306_s5  }
 0x116 PF: > { %s332_s22 = sand.u32 1, %s638_s12   ;;  %p878_p8 = scmp.ne.s32.totalorder %s871_s23, 0 }
 0x117   : > { %p879_p10 = scmp.ge.s32.totalorder %s658_s17, 2  ;;  %s333_s24 = scalar_lea.sflag [#allocation4], %s332_s22 }
 0x119   : > { %p460_p0 = pnand %p879_p10, %p878_p8 }
 0x11b   : > { %p461_p2 = pneg %p460_p0 }
 0x11d   : > { %633 = dma.done.wait (%p461_p2), %s333_s24, 128  }
 0x11e   : > { %635 = vsyncadd (%p461_p2), %s333_s24, 4294967168  ;;  %s20_s17 = sadd.s32 1, %s658_s17   ;;  %s880_s12 = smov %s642_s13 }
 0x11f   : > { %p17_p3 = scmp.ge.s32.totalorder %s20_s17, 4   ;;  %s881_s13 = smov %s646_s14 }
 0x120   : > { %s882_s14 = smov %s783_s19  ;;  %s883_s15 = smov %s654_s16 }
 0x121   : > { %s884_s16 = smov %s886_s28  ;;  %19 = sbr.rel (!%p17_p3) target bundleno = 7 (0x7), region = 81 }
 0x126   :  { %338 = vsyncpa [#allocation3], 1 }
 0x127   :  { %340 = vsyncpa [#allocation3 + $0x1], 1 }
 0x128   :  { %341 = vsyncpa [#allocation6], 1 }
 0x129   :  { %342 = vsyncpa [#allocation4], 1 }
 0x12a   :  { %344 = vsyncpa [#allocation4 + $0x1], 1 }

</bundles_post_ra>
